<compile_context>
chip_gen: v6e
topology: v6e:2x2x1
jax: 0.10.0
libtpu: 0.0.40
codegen_flags: <defaults>
</compile_context>

<pallas_src>
import functools

import jax
import jax.numpy as jnp
from jax.experimental import pallas as pl
from jax.experimental.pallas import tpu as pltpu


def _round_up(x: int, m: int) -> int:
    return (x + m - 1) // m * m


def glove_loss_kernel(cen_ref, tar_ref, sc_ref, out_ref):
    """cen/tar: (TILE_B, D+2) augmented rows [emb, bias, 1] / [emb, 1, bias]
    in stream dtype; sc: (TILE_B, 2) f32 = [cooc, weight];
    out: (1, 8, 128) f32 per-tile partial (tile loss broadcast over the block)."""
    center = cen_ref[...].astype(jnp.float32)
    target = tar_ref[...].astype(jnp.float32)

    # Row-wise dot of the augmented rows == emb_v . emb_u + v_bias + u_bias.
    inner = jnp.sum(center * target, axis=-1, keepdims=True)   # (TILE_B, 1)
    diff = inner - sc_ref[:, 0:1]                               # ... - cooc
    tile_loss = jnp.sum(sc_ref[:, 1:2] * diff * diff)           # weighted SSE

    out_ref[...] = jnp.full(out_ref.shape, tile_loss, dtype=jnp.float32)


@functools.partial(jax.jit, static_argnames=("tile_b", "stream_dtype"))
def glove_forward(params, center_words, target_words, coocs, weights,
                  tile_b=None, stream_dtype=jnp.float32):
    """center_words/target_words: (B, 1) int32; coocs/weights: (B, 1) f32.

    Returns the scalar GloVe loss:
        sum( weights * (target.center + v_bias + u_bias - coocs)^2 )
    """
    emb_v = params["embedding_v"].astype(jnp.float32)
    emb_u = params["embedding_u"].astype(jnp.float32)
    v_bias = params["v_bias"].astype(jnp.float32)
    u_bias = params["u_bias"].astype(jnp.float32)

    V, D = emb_v.shape
    ones_col = jnp.ones((V, 1), jnp.float32)

    # Augmented tables (in real training these would be built once, not per
    # step): the ones column lets the other side's bias ride the row-dot.
    table_v = jnp.concatenate([emb_v, v_bias, ones_col], axis=1).astype(stream_dtype)
    table_u = jnp.concatenate([emb_u, ones_col, u_bias], axis=1).astype(stream_dtype)

    cw = center_words[:, 0]
    tw = target_words[:, 0]

    # Embedding gathers (glue, plain JAX). See TODO(synk) above for fusing.
    center_rows = jnp.take(table_v, cw, axis=0)   # (B, D+2)
    target_rows = jnp.take(table_u, tw, axis=0)   # (B, D+2)

    # Packed per-row scalars: one (B, 2) stream instead of several (B, 1) ones.
    scalars = jnp.concatenate([coocs, weights], axis=1).astype(jnp.float32)

    B, D_aug = center_rows.shape
    itemsize = jnp.dtype(stream_dtype).itemsize

    # Bytes-targeted tile sizing: ~2 MiB per embedding block, multiple of 8
    # rows, never larger than the (rounded-up) batch.
    if tile_b is None:
        target_block_bytes = 2 * 1024 * 1024
        tile_b = max(8, target_block_bytes // (D_aug * itemsize))
    tile_b = _round_up(int(tile_b), 8)
    tile_b = min(tile_b, _round_up(B, 8))

    B_pad = _round_up(B, tile_b)
    if B_pad != B:
        pad = B_pad - B
        # Zero padding => padded rows have weight 0 (and zero rows) => 0 loss.
        center_rows = jnp.pad(center_rows, ((0, pad), (0, 0)))
        target_rows = jnp.pad(target_rows, ((0, pad), (0, 0)))
        scalars = jnp.pad(scalars, ((0, pad), (0, 0)))
    num_tiles = B_pad // tile_b

    cost = pl.CostEstimate(
        flops=4 * B_pad * D_aug,
        transcendentals=0,
        bytes_accessed=(2 * B_pad * D_aug * itemsize
                        + B_pad * 2 * 4
                        + num_tiles * 8 * 128 * 4),
    )

    partials = pl.pallas_call(
        glove_loss_kernel,
        out_shape=jax.ShapeDtypeStruct((num_tiles, 8, 128), jnp.float32),
        grid=(num_tiles,),
        in_specs=[
            pl.BlockSpec((tile_b, D_aug), lambda i: (i, 0)),
            pl.BlockSpec((tile_b, D_aug), lambda i: (i, 0)),
            pl.BlockSpec((tile_b, 2), lambda i: (i, 0)),
        ],
        out_specs=pl.BlockSpec((1, 8, 128), lambda i: (i, 0, 0)),
        compiler_params=pltpu.CompilerParams(
            dimension_semantics=("parallel",),
        ),
        cost_estimate=cost,
    )(center_rows, target_rows, scalars)

    # One partial per tile (each tile's scalar is broadcast over its block).
    return jnp.sum(partials[:, 0, 0])


def init_params(key, vocab_size, projection_dim):
    init_range = (2.0 / (vocab_size + projection_dim)) ** 0.5
    k1, k2, k3, k4 = jax.random.split(key, 4)
    u = lambda k, shape: jax.random.uniform(
        k, shape, minval=-init_range, maxval=init_range, dtype=jnp.float32
    )
    return {
        "embedding_v": u(k1, (vocab_size, projection_dim)),
        "embedding_u": u(k2, (vocab_size, projection_dim)),
        "v_bias": u(k3, (vocab_size, 1)),
        "u_bias": u(k4, (vocab_size, 1)),
    }


def _reference_loss(params, center_words, target_words, coocs, weights):
    cw = center_words[:, 0]
    tw = target_words[:, 0]
    ce = jnp.take(params["embedding_v"], cw, axis=0)
    te = jnp.take(params["embedding_u"], tw, axis=0)
    cb = jnp.take(params["v_bias"], cw, axis=0)
    tb = jnp.take(params["u_bias"], tw, axis=0)
    inner = jnp.sum(te * ce, axis=-1, keepdims=True)
    return jnp.sum(weights * (inner + cb + tb - coocs) ** 2)


if __name__ == "__main__":
    vocab_size = 50
    projection_dim = 32

    key = jax.random.PRNGKey(0)
    kp, kc, kt, kco, kw = jax.random.split(key, 5)
    params = init_params(kp, vocab_size, projection_dim)

    # Case 1: small batch, single grid step, auto tile, f32 streaming.
    batch = 8
    cw1 = jax.random.randint(kc, (batch, 1), 0, vocab_size, dtype=jnp.int32)
    tw1 = jax.random.randint(kt, (batch, 1), 0, vocab_size, dtype=jnp.int32)
    co1 = jax.random.uniform(kco, (batch, 1), dtype=jnp.float32)
    w1 = jax.random.uniform(kw, (batch, 1), dtype=jnp.float32)

    loss1 = jax.block_until_ready(glove_forward(params, cw1, tw1, co1, w1))
    ref1 = _reference_loss(params, cw1, tw1, co1, w1)
    assert jnp.allclose(loss1, ref1, rtol=1e-5, atol=1e-5), (loss1, ref1)

    # Case 2: grid + zero-padded tail; non-multiple-of-8 user tile_b (rounds to 8).
    batch2 = 50
    k2c, k2t, k2co, k2w = jax.random.split(jax.random.PRNGKey(1), 4)
    cw2 = jax.random.randint(k2c, (batch2, 1), 0, vocab_size, dtype=jnp.int32)
    tw2 = jax.random.randint(k2t, (batch2, 1), 0, vocab_size, dtype=jnp.int32)
    co2 = jax.random.uniform(k2co, (batch2, 1), dtype=jnp.float32)
    w2 = jax.random.uniform(k2w, (batch2, 1), dtype=jnp.float32)

    loss2 = jax.block_until_ready(glove_forward(params, cw2, tw2, co2, w2, tile_b=6))
    ref2 = _reference_loss(params, cw2, tw2, co2, w2)
    assert jnp.allclose(loss2, ref2, rtol=1e-5, atol=1e-5), (loss2, ref2)

    # Case 3: bf16 streaming of the gathered rows (f32 accumulation in-kernel).
    batch3 = 64
    k3c, k3t, k3co, k3w = jax.random.split(jax.random.PRNGKey(2), 4)
    cw3 = jax.random.randint(k3c, (batch3, 1), 0, vocab_size, dtype=jnp.int32)
    tw3 = jax.random.randint(k3t, (batch3, 1), 0, vocab_size, dtype=jnp.int32)
    co3 = jax.random.uniform(k3co, (batch3, 1), dtype=jnp.float32)
    w3 = jax.random.uniform(k3w, (batch3, 1), dtype=jnp.float32)

    loss3 = jax.block_until_ready(
        glove_forward(params, cw3, tw3, co3, w3, tile_b=16,
                      stream_dtype=jnp.bfloat16)
    )
    ref3 = _reference_loss(params, cw3, tw3, co3, w3)
    assert jnp.allclose(loss3, ref3, rtol=1e-2, atol=1e-2), (loss3, ref3)

    print("KERNEL_OK")
</pallas_src>

<mosaic_0001>
module attributes {stable_mosaic.version = 11 : i64} {
  func.func @glove_loss_kernel(%arg0: i32, %arg1: memref<8x34xf32, #tpu.memory_space<vmem>>, %arg2: memref<8x34xf32, #tpu.memory_space<vmem>>, %arg3: memref<8x2xf32, #tpu.memory_space<vmem>>, %arg4: memref<1x8x128xf32, #tpu.memory_space<vmem>>) attributes {dimension_semantics = [#tpu.dimension_semantics<parallel>], iteration_bounds = array<i64: 1>, scalar_prefetch = 0 : i64, scratch_operands = 0 : i64, tpu.core_type = #tpu.core_type<tc>, window_params = [{transform_indices = @transform_0, window_bounds = array<i64: 8, 34>}, {transform_indices = @transform_1, window_bounds = array<i64: 8, 34>}, {transform_indices = @transform_2, window_bounds = array<i64: 8, 2>}, {transform_indices = @transform_3, window_bounds = array<i64: 1, 8, 128>}]} {
    %c0 = arith.constant 0 : index
    %c0_0 = arith.constant 0 : index
    %0 = vector.load %arg1[%c0, %c0_0] : memref<8x34xf32, #tpu.memory_space<vmem>>, vector<8x34xf32>
    %c0_1 = arith.constant 0 : index
    %c0_2 = arith.constant 0 : index
    %1 = vector.load %arg2[%c0_1, %c0_2] : memref<8x34xf32, #tpu.memory_space<vmem>>, vector<8x34xf32>
    %2 = arith.mulf %0, %1 : vector<8x34xf32>
    %cst = arith.constant dense<0.000000e+00> : vector<8xf32>
    %3 = vector.multi_reduction <add>, %2, %cst [1] : vector<8x34xf32> to vector<8xf32>
    %4 = vector.shape_cast %3 : vector<8xf32> to vector<8x1xf32>
    %c0_3 = arith.constant 0 : index
    %c0_4 = arith.constant 0 : index
    %5 = vector.load %arg3[%c0_3, %c0_4] : memref<8x2xf32, #tpu.memory_space<vmem>>, vector<8x1xf32>
    %6 = arith.subf %4, %5 : vector<8x1xf32>
    %c0_5 = arith.constant 0 : index
    %c1 = arith.constant 1 : index
    %7 = vector.load %arg3[%c0_5, %c1] : memref<8x2xf32, #tpu.memory_space<vmem>>, vector<8x1xf32>
    %8 = arith.mulf %7, %6 : vector<8x1xf32>
    %9 = arith.mulf %8, %6 : vector<8x1xf32>
    %10 = vector.shape_cast %9 : vector<8x1xf32> to vector<1x8x1xf32>
    %cst_6 = arith.constant dense<0.000000e+00> : vector<1xf32>
    %11 = vector.multi_reduction <add>, %10, %cst_6 [1, 2] : vector<1x8x1xf32> to vector<1xf32>
    %12 = vector.shape_cast %11 : vector<1xf32> to vector<1x1x1xf32>
    %13 = vector.extract %12[0, 0, 0] : f32 from vector<1x1x1xf32>
    %14 = vector.broadcast %13 : f32 to vector<1x8x128xf32>
    %c0_7 = arith.constant 0 : index
    %c0_8 = arith.constant 0 : index
    %c0_9 = arith.constant 0 : index
    %15 = vector.load %arg4[%c0_7, %c0_8, %c0_9] : memref<1x8x128xf32, #tpu.memory_space<vmem>>, vector<1x8x128xf32>
    tpu.vector_store %arg4[%c0_7, %c0_8, %c0_9], %14 {strides = array<i32>} : memref<1x8x128xf32, #tpu.memory_space<vmem>>, vector<1x8x128xf32>,
    return
  }
  func.func @transform_0(%arg0: i32) -> (i32, i32) {
    %c0_i32 = arith.constant 0 : i32
    %c0_i32_0 = arith.constant 0 : i32
    return %arg0, %c0_i32 : i32, i32
  }
  func.func @transform_1(%arg0: i32) -> (i32, i32) {
    %c0_i32 = arith.constant 0 : i32
    %c0_i32_0 = arith.constant 0 : i32
    return %arg0, %c0_i32 : i32, i32
  }
  func.func @transform_2(%arg0: i32) -> (i32, i32) {
    %c0_i32 = arith.constant 0 : i32
    %c0_i32_0 = arith.constant 0 : i32
    return %arg0, %c0_i32 : i32, i32
  }
  func.func @transform_3(%arg0: i32) -> (i32, i32, i32) {
    %c0_i32 = arith.constant 0 : i32
    %c0_i32_0 = arith.constant 0 : i32
    %c0_i32_1 = arith.constant 0 : i32
    return %arg0, %c0_i32, %c0_i32_0 : i32, i32, i32
  }
}

</mosaic_0001>

<bundles_post_ra>
// kernel: glove_forward.1
= control target key start
LH: loop header
LB: loop body
LE: loop exit
PB: predicated region body
PF: predicated region fallthrough
CT: control target
= control target key end

     0   :  { %vm17_vm0 = vcmask 277504   ;;  %s54_s18 = smov 1   ;;  %vm33_vm1 = vcmask 7168   ;;  %s88_s0 = inlined_call_operand.vmem [shape: f32[8,34], index: 0, kind: input, shape index: {}]   ;;  %s89_s1 = inlined_call_operand.vmem [shape: f32[8,34], index: 1, kind: input, shape index: {}]   ;;  %s90_s2 = inlined_call_operand.vmem [shape: f32[8,2], index: 2, kind: input, shape index: {}]   ;;  %s91_s3 = inlined_call_operand.vmem [shape: f32[1,8,128], index: 3, kind: output, shape index: {}]  }
   0x1   :  { %v14_v0 = vld [vmem:[%s88_s0] sm:$0xff]  ;;  %s55_s0 = smov 127  }
   0x2   :  { %v15_v1 = vld [vmem:[%s89_s1] sm:$0xff] }
   0x3   :  { %v16_v2 = vmul.f32 %v15_v1, %v14_v0  ;;  %v21_v4 = vld [vmem:[%s90_s2] sm:$0xff] }
   0x5   :  { %v18_v3 = vsel %vm17_vm0, %v16_v2, 0.0 }
   0x6   :  { %19 = vadd.xlane.f32.xlu0 %v18_v3 }
  0x8f   :  { %v20_v5 = vpop.xlane.xlu0 %19 }
  0x90   :  { %v22_v6 = vsub.f32 %v20_v5, %v21_v4 }
  0x92   :  { %24 = vrot.lane.b32.xlu0 %v22_v6, %s54_s18 }
 0x104   :  { %v25_v7 = vpop.permute.xlu0 %24 }
 0x105   :  { %v27_v8 = vmul.f32 %v25_v7, %v21_v4 }
 0x107   :  { %v28_v9 = vmul.f32 %v27_v8, %v25_v7 }
 0x109   :  { %30 = vrot.lane.b32.xlu1 %v28_v9, %s55_s0 }
 0x17b   :  { %v31_v10 = vpop.permute.xlu1 %30 }
 0x17c   :  { %v34_v11 = vsel %vm33_vm1, %v31_v10, 0.0 }
 0x17d   :  { %35 = vadd.xlane.f32.xlu1 %v34_v11 }
 0x206   :  { %v36_v12 = vpop.xlane.xlu1 %35 }
 0x207   :  { %v37_v13 = vrot.slane %v36_v12, 4 }
 0x209   :  { %v38_v14 = vadd.f32 %v37_v13, %v36_v12 }
 0x20b   :  { %v39_v15 = vrot.slane %v38_v14, 2 }
 0x20d   :  { %v40_v16 = vadd.f32 %v39_v15, %v38_v14 }
 0x20f   :  { %v41_v17 = vrot.slane %v40_v16, 1 }
 0x211   :  { %v42_v18 = vadd.f32 %v41_v17, %v40_v16 }
 0x213   :  { %50 = vpush %v42_v18 }
 0x244   :  { %s51_s1 = spop %50 }
 0x245   :  { %v44_v19 = vstv %s51_s1 }
 0x246   :  { %45 = vst [vmem:[%s91_s3] sm:$0xff] %v44_v19 }

</bundles_post_ra>
